<compile_context>
chip_gen: v6e
topology: v6e:2x2x1
jax: 0.10.0
libtpu: 0.0.40
codegen_flags: <defaults>
</compile_context>

<pallas_src>
import functools

import jax
import jax.numpy as jnp
from jax.experimental import pallas as pl
from jax.experimental.pallas import tpu as pltpu

TN = 512  # output-tile width: grid=(2,) for N=1000 (one tile per TC on v7x)


def _linear_model_kernel(x_ref, wt_ref, b_ref, g_ref, beta_ref, o_ref, *,
                         batch, pool_type, eps):
    # x_ref: (MP, K, F) f32, batch zero-padded to MP rows (BN sees the full batch).
    x = x_ref[...]

    # Adaptive pool == reduction over the window axis (single XLU pass).
    if pool_type == "max":
        pooled = jnp.max(x, axis=1)                  # (MP, F)
    else:
        pooled = jnp.mean(x, axis=1)                 # (MP, F)

    mp, _ = pooled.shape
    row_mask = (jax.lax.broadcasted_iota(jnp.int32, (mp, 1), 0)
                < batch).astype(pooled.dtype)        # (MP, 1): 1 for real rows
    pooled = pooled * row_mask                       # padded rows exactly zero

    # BatchNorm1d, training mode: batch stats over the REAL batch only
    # (padded rows are zero and masked out of the variance sum).
    inv_b = 1.0 / batch
    mu = jnp.sum(pooled, axis=0, keepdims=True) * inv_b          # (1, F)
    diff = (pooled - mu) * row_mask
    var = jnp.sum(diff * diff, axis=0, keepdims=True) * inv_b    # (1, F) biased
    xhat = (pooled - mu) * jax.lax.rsqrt(var + eps)
    xhat = xhat * g_ref[...] + beta_ref[...]                     # (MP, F)

    # Linear tile: bf16 LHS x bf16 weight, f32 accumulation on the MXU.
    lhs = xhat.astype(jnp.bfloat16)
    o_ref[...] = (jnp.dot(lhs, wt_ref[...],
                          preferred_element_type=jnp.float32)
                  + b_ref[...])


def prepare_linear_params(weight, bias, *, tn=TN):
    """One-time (parameter-load-time) weight pad + bf16 cast.

    weight: (N, F) PyTorch Linear layout.  bias: (N,).
    Returns wt_p: (F, n_pad) bf16, b_p: (1, n_pad) f32 with zero padding columns.
    """
    n_out, f = weight.shape
    n_pad = pl.cdiv(n_out, tn) * tn                  # 1000 -> 1024 (lane-dense)
    wt_p = jnp.zeros((f, n_pad), jnp.bfloat16).at[:, :n_out].set(
        weight.T.astype(jnp.bfloat16))
    b_p = jnp.zeros((1, n_pad), jnp.float32).at[:, :n_out].set(
        bias.reshape(1, n_out).astype(jnp.float32))
    return wt_p, b_p


def linear_model_forward(x, wt_p, b_p, gamma, beta, *, n_out, target_size,
                         pool_type, tn=TN):
    """x: (B, C, H, W) NCHW.  wt_p/b_p: outputs of prepare_linear_params."""
    B, C, H, W = x.shape
    t = target_size
    assert H % t == 0 and W % t == 0, "adaptive pool assumed evenly divisible"
    assert B > 1, "BatchNorm1d batch statistics are degenerate for batch=1"
    kh, kw = H // t, W // t
    K = kh * kw
    F = C * t * t
    n_pad = wt_p.shape[1]
    assert wt_p.shape[0] == F and n_pad % tn == 0 and n_pad >= n_out

    MP = max(8, pl.cdiv(B, 8) * 8)                   # padded M (sublane) dim

    # Glue: (B,C,H,W) -> (B,kh,kw,C,t,t) -> (B, K, F); F ordering matches
    # PyTorch Flatten of the pooled NCHW tensor (c-major, then oh, ow).
    xr = x.reshape(B, C, t, kh, t, kw).transpose(0, 3, 5, 1, 2, 4)
    xr = xr.reshape(B, K, F).astype(jnp.float32)
    xr_p = jnp.zeros((MP, K, F), jnp.float32).at[:B].set(xr)

    gamma = gamma.reshape(1, F).astype(jnp.float32)
    beta = beta.reshape(1, F).astype(jnp.float32)

    kernel = functools.partial(_linear_model_kernel, batch=B,
                               pool_type=pool_type, eps=1e-5)

    cost = pl.CostEstimate(
        flops=2 * MP * F * n_pad,
        transcendentals=F * (n_pad // tn),
        bytes_accessed=(F * n_pad * 2          # bf16 weight (dominant)
                        + MP * K * F * 4       # input slab
                        + MP * n_pad * 4       # output
                        + n_pad * 4 + 2 * F * 4))

    out = pl.pallas_call(
        kernel,
        out_shape=jax.ShapeDtypeStruct((MP, n_pad), jnp.float32),
        grid_spec=pltpu.PrefetchScalarGridSpec(
            num_scalar_prefetch=0,
            grid=(n_pad // tn,),
            in_specs=[
                pl.BlockSpec((MP, K, F), lambda j: (0, 0, 0)),   # input slab
                pl.BlockSpec((F, tn), lambda j: (0, j)),         # weight^T tile
                pl.BlockSpec((1, tn), lambda j: (0, j)),         # bias tile
                pl.BlockSpec((1, F), lambda j: (0, 0)),          # BN gamma
                pl.BlockSpec((1, F), lambda j: (0, 0)),          # BN beta
            ],
            out_specs=pl.BlockSpec((MP, tn), lambda j: (0, j)),
        ),
        compiler_params=pltpu.CompilerParams(
            dimension_semantics=("parallel",),
        ),
        cost_estimate=cost,
    )(xr_p, wt_p, b_p, gamma, beta)

    return out[:B, :n_out]


def _reference(x, weight, bias, gamma, beta, *, target_size, pool_type,
               eps=1e-5):
    B, C, H, W = x.shape
    t = target_size
    kh, kw = H // t, W // t
    xr = x.reshape(B, C, t, kh, t, kw)
    if pool_type == "max":
        pooled = xr.max(axis=(3, 5))
    else:
        pooled = xr.mean(axis=(3, 5))
    flat = pooled.reshape(B, -1)
    mu = flat.mean(axis=0, keepdims=True)
    var = ((flat - mu) ** 2).mean(axis=0, keepdims=True)
    xhat = (flat - mu) / jnp.sqrt(var + eps) * gamma.reshape(1, -1) \
        + beta.reshape(1, -1)
    return xhat @ weight.T + bias.reshape(1, -1)


if __name__ == "__main__":
    # Small shapes consistent with the module's forward.
    B, C, H, W = 2, 4, 16, 16          # batch, n_filter, spatial
    target_size = 4
    F = C * target_size * target_size  # 64
    N_OUT = 1000

    key = jax.random.PRNGKey(0)
    kx, kw_ = jax.random.split(key)
    x = jax.random.normal(kx, (B, C, H, W), dtype=jnp.float32)

    # Deterministic parameter init mirroring LinearModel.initilize():
    #   Linear.weight ~ N(0, 0.01), Linear.bias = 0; BatchNorm defaults.
    weight = 0.01 * jax.random.normal(kw_, (N_OUT, F), dtype=jnp.float32)
    bias = jnp.zeros((N_OUT,), dtype=jnp.float32)
    gamma = jnp.ones((1, F), dtype=jnp.float32)
    beta = jnp.zeros((1, F), dtype=jnp.float32)

    # Hoisted once at parameter-load time: weight pad + bf16 cast (NOT per forward).
    wt_p, b_p = jax.block_until_ready(prepare_linear_params(weight, bias, tn=TN))

    ok = True
    for pool_type in ("mean", "max"):
        fwd = jax.jit(functools.partial(
            linear_model_forward, n_out=N_OUT, target_size=target_size,
            pool_type=pool_type, tn=TN))
        out = jax.block_until_ready(fwd(x, wt_p, b_p, gamma, beta))
        ref = _reference(x, weight, bias, gamma, beta,
                         target_size=target_size, pool_type=pool_type)
        assert out.shape == (B, N_OUT)
        ok &= bool(jnp.allclose(out, ref, rtol=1e-2, atol=1e-2))

    assert ok
    print("KERNEL_OK")
</pallas_src>

<mosaic_0001>
module attributes {stable_mosaic.version = 11 : i64} {
  func.func @_linear_model_kernel(%arg0: i32, %arg1: memref<8x16x64xf32, #tpu.memory_space<vmem>>, %arg2: memref<64x512xbf16, #tpu.memory_space<vmem>>, %arg3: memref<1x512xf32, #tpu.memory_space<vmem>>, %arg4: memref<1x64xf32, #tpu.memory_space<vmem>>, %arg5: memref<1x64xf32, #tpu.memory_space<vmem>>, %arg6: memref<8x512xf32, #tpu.memory_space<vmem>>) attributes {dimension_semantics = [#tpu.dimension_semantics<parallel>], iteration_bounds = array<i64: 2>, scalar_prefetch = 0 : i64, scratch_operands = 0 : i64, tpu.core_type = #tpu.core_type<tc>, window_params = [{pipeline_mode = #tpu.pipeline_mode<synchronous>, transform_indices = @transform_0, window_bounds = array<i64: 8, 16, 64>}, {transform_indices = @transform_1, window_bounds = array<i64: 64, 512>}, {transform_indices = @transform_2, window_bounds = array<i64: 1, 512>}, {pipeline_mode = #tpu.pipeline_mode<synchronous>, transform_indices = @transform_3, window_bounds = array<i64: 1, 64>}, {pipeline_mode = #tpu.pipeline_mode<synchronous>, transform_indices = @transform_4, window_bounds = array<i64: 1, 64>}, {transform_indices = @transform_5, window_bounds = array<i64: 8, 512>}]} {
    %c0 = arith.constant 0 : index
    %c0_0 = arith.constant 0 : index
    %c0_1 = arith.constant 0 : index
    %0 = vector.load %arg1[%c0, %c0_0, %c0_1] : memref<8x16x64xf32, #tpu.memory_space<vmem>>, vector<8x16x64xf32>
    %cst = arith.constant dense<0.000000e+00> : vector<8x64xf32>
    %1 = vector.multi_reduction <add>, %0, %cst [1] : vector<8x16x64xf32> to vector<8x64xf32>
    %cst_2 = arith.constant 1.600000e+01 : f32
    %2 = vector.broadcast %cst_2 : f32 to vector<8x64xf32>
    %3 = arith.divf %1, %2 : vector<8x64xf32>
    %4 = tpu.iota {dimensions = array<i32: 0>} : vector<8x1xi32>
    %c2_i32 = arith.constant 2 : i32
    %5 = vector.broadcast %c2_i32 : i32 to vector<8x1xi32>
    %6 = arith.cmpi slt, %4, %5 : vector<8x1xi32>
    %7 = arith.extui %6 : vector<8x1xi1> to vector<8x1xi32>
    %8 = arith.sitofp %7 : vector<8x1xi32> to vector<8x1xf32>
    %9 = vector.broadcast %8 : vector<8x1xf32> to vector<8x64xf32>
    %10 = arith.mulf %3, %9 : vector<8x64xf32>
    %cst_3 = arith.constant dense<0.000000e+00> : vector<64xf32>
    %11 = vector.multi_reduction <add>, %10, %cst_3 [0] : vector<8x64xf32> to vector<64xf32>
    %12 = vector.shape_cast %11 : vector<64xf32> to vector<1x64xf32>
    %cst_4 = arith.constant 5.000000e-01 : f32
    %13 = vector.broadcast %cst_4 : f32 to vector<1x64xf32>
    %14 = arith.mulf %12, %13 : vector<1x64xf32>
    %15 = vector.broadcast %14 : vector<1x64xf32> to vector<8x64xf32>
    %16 = arith.subf %10, %15 : vector<8x64xf32>
    %17 = vector.broadcast %8 : vector<8x1xf32> to vector<8x64xf32>
    %18 = arith.mulf %16, %17 : vector<8x64xf32>
    %19 = arith.mulf %18, %18 : vector<8x64xf32>
    %cst_5 = arith.constant dense<0.000000e+00> : vector<64xf32>
    %20 = vector.multi_reduction <add>, %19, %cst_5 [0] : vector<8x64xf32> to vector<64xf32>
    %21 = vector.shape_cast %20 : vector<64xf32> to vector<1x64xf32>
    %cst_6 = arith.constant 5.000000e-01 : f32
    %22 = vector.broadcast %cst_6 : f32 to vector<1x64xf32>
    %23 = arith.mulf %21, %22 : vector<1x64xf32>
    %24 = vector.broadcast %14 : vector<1x64xf32> to vector<8x64xf32>
    %25 = arith.subf %10, %24 : vector<8x64xf32>
    %cst_7 = arith.constant 9.99999974E-6 : f32
    %26 = vector.broadcast %cst_7 : f32 to vector<1x64xf32>
    %27 = arith.addf %23, %26 : vector<1x64xf32>
    %28 = math.rsqrt %27 : vector<1x64xf32>
    %29 = vector.broadcast %28 : vector<1x64xf32> to vector<8x64xf32>
    %30 = arith.mulf %25, %29 : vector<8x64xf32>
    %c0_8 = arith.constant 0 : index
    %c0_9 = arith.constant 0 : index
    %31 = vector.load %arg4[%c0_8, %c0_9] : memref<1x64xf32, #tpu.memory_space<vmem>>, vector<1x64xf32>
    %32 = vector.broadcast %31 : vector<1x64xf32> to vector<8x64xf32>
    %33 = arith.mulf %30, %32 : vector<8x64xf32>
    %c0_10 = arith.constant 0 : index
    %c0_11 = arith.constant 0 : index
    %34 = vector.load %arg5[%c0_10, %c0_11] : memref<1x64xf32, #tpu.memory_space<vmem>>, vector<1x64xf32>
    %35 = vector.broadcast %34 : vector<1x64xf32> to vector<8x64xf32>
    %36 = arith.addf %33, %35 : vector<8x64xf32>
    %37 = arith.truncf %36 : vector<8x64xf32> to vector<8x64xbf16>
    %c0_12 = arith.constant 0 : index
    %c0_13 = arith.constant 0 : index
    %38 = vector.load %arg2[%c0_12, %c0_13] : memref<64x512xbf16, #tpu.memory_space<vmem>>, vector<64x512xbf16>
    %cst_14 = arith.constant dense<0.000000e+00> : vector<8x512xf32>
    %39 = tpu.matmul %37, %38, %cst_14 {dimension_numbers = #tpu.dot_dimension_numbers<[1], [0], [0], [1], [0, 0, 1, 1], [], []>} : vector<8x64xbf16>, vector<64x512xbf16>, vector<8x512xf32> -> vector<8x512xf32>
    %c0_15 = arith.constant 0 : index
    %c0_16 = arith.constant 0 : index
    %40 = vector.load %arg3[%c0_15, %c0_16] : memref<1x512xf32, #tpu.memory_space<vmem>>, vector<1x512xf32>
    %41 = vector.broadcast %40 : vector<1x512xf32> to vector<8x512xf32>
    %42 = arith.addf %39, %41 : vector<8x512xf32>
    %c0_17 = arith.constant 0 : index
    %c0_18 = arith.constant 0 : index
    %43 = vector.load %arg6[%c0_17, %c0_18] : memref<8x512xf32, #tpu.memory_space<vmem>>, vector<8x512xf32>
    tpu.vector_store %arg6[%c0_17, %c0_18], %42 {strides = array<i32>} : memref<8x512xf32, #tpu.memory_space<vmem>>, vector<8x512xf32>,
    return
  }
  func.func @transform_0(%arg0: i32) -> (i32, i32, i32) {
    %c0_i32 = arith.constant 0 : i32
    %c0_i32_0 = arith.constant 0 : i32
    %c0_i32_1 = arith.constant 0 : i32
    %c0_i32_2 = arith.constant 0 : i32
    return %c0_i32, %c0_i32_0, %c0_i32_1 : i32, i32, i32
  }
  func.func @transform_1(%arg0: i32) -> (i32, i32) {
    %c0_i32 = arith.constant 0 : i32
    %c0_i32_0 = arith.constant 0 : i32
    return %c0_i32, %arg0 : i32, i32
  }
  func.func @transform_2(%arg0: i32) -> (i32, i32) {
    %c0_i32 = arith.constant 0 : i32
    %c0_i32_0 = arith.constant 0 : i32
    return %c0_i32, %arg0 : i32, i32
  }
  func.func @transform_3(%arg0: i32) -> (i32, i32) {
    %c0_i32 = arith.constant 0 : i32
    %c0_i32_0 = arith.constant 0 : i32
    %c0_i32_1 = arith.constant 0 : i32
    return %c0_i32, %c0_i32_0 : i32, i32
  }
  func.func @transform_4(%arg0: i32) -> (i32, i32) {
    %c0_i32 = arith.constant 0 : i32
    %c0_i32_0 = arith.constant 0 : i32
    %c0_i32_1 = arith.constant 0 : i32
    return %c0_i32, %c0_i32_0 : i32, i32
  }
  func.func @transform_5(%arg0: i32) -> (i32, i32) {
    %c0_i32 = arith.constant 0 : i32
    %c0_i32_0 = arith.constant 0 : i32
    return %c0_i32, %arg0 : i32, i32
  }
}

</mosaic_0001>

<bundles_post_ra>
// kernel: linear_model_forward.1
= control target key start
LH: loop header
LB: loop body
LE: loop exit
PB: predicated region body
PF: predicated region fallthrough
CT: control target
= control target key end

     0   :  { %s1026_s18 = smov 0   ;;  %s1028_s19 = smov 0   ;;  %s1261_s0 = inlined_call_operand.vmem [shape: f32[8,16,64], index: 0, kind: input, shape index: {}]   ;;  %s1262_s1 = inlined_call_operand.vmem [shape: bf16[64,1024], index: 1, kind: input, shape index: {}]   ;;  %s1263_s2 = inlined_call_operand.vmem [shape: f32[1,1024], index: 2, kind: input, shape index: {}]   ;;  %s1264_s3 = inlined_call_operand.vmem [shape: f32[1,64], index: 3, kind: input, shape index: {}]   ;;  %s1265_s4 = inlined_call_operand.vmem [shape: f32[1,64], index: 4, kind: input, shape index: {}]   ;;  %s1266_s5 = inlined_call_operand.vmem [shape: f32[8,1024], index: 5, kind: output, shape index: {}]  }
   0x1   :  { %s1030_s20 = smov 0  }
   0x2 LB: > { %s882_s21 = sadd.s32 4294967295, %s992_s20   ;;  %s1043_s22 = sadd.s32 1, %s992_s20   ;;  %s992_s20 = sphi %s1030_s20, %s1269_s20   ;;  %s988_s19 = sphi %s1028_s19, %s1268_s19   ;;  %s984_s18 = sphi %s1026_s18, %s1267_s18  }
   0x3   : > { %s40_s23 = ssub.s32 %s992_s20, %s1043_s22  ;;  %s43_s24 = sadd.s32 1, %s988_s19 }
   0x4   : > { %p41_p0 = scmp.eq.s32.totalorder %s40_s23, 0  ;;  %p50_p1 = scmp.ne.s32.totalorder %s988_s19, %s984_s18 }
   0x5   : > { %p51_p2 = scmp.eq.s32.totalorder %s992_s20, 0  ;;  %p885_p4 = scmp.ge.s32.totalorder %s992_s20, 2 }
   0x6   : > { %s1052_s25 = scalar_select %p41_p0, %s988_s19, %s43_s24  }
   0x7   : > { %p52_p3 = por %p51_p2, %p50_p1  ;;  %179 = sbr.rel (%p885_p4) target bundleno = 24 (0x18), region = 28 }
   0xc   : > { %182 = sbr.rel (!%p52_p3) target bundleno = 24 (0x18), region = 32  ;;  %s184_s26 = sand.u32 (%p52_p3), 1, %s988_s19  }
   0xd   : > { %s917_s27 = sshll.u32 (%p52_p3), %s992_s20, 4  ;;  %s886_s28 = sshll.u32 (%p52_p3), %s184_s26, 7 }
   0xe   : > { %s1060_s6 = scalar_lea.vmem (%p52_p3), %s1262_s1, %s917_s27  ;;  %s186_s7 = scalar_lea.vmem (%p52_p3), [#allocation2], %s886_s28 }
   0xf   : > { %v202_v0 = vld [vmem:[%s1060_s6] sm:$0xff] (%p52_p3)  ;;  %v204_v1 = vld [vmem:[%s1060_s6 + $0x8] sm:$0xff] (%p52_p3) }
  0x10   : > { %v206_v2 = vld [vmem:[%s1060_s6 + $0x20] sm:$0xff] (%p52_p3)  ;;  %203 = vst [vmem:[%s186_s7] sm:$0xff] (%p52_p3), %v202_v0  ;;  %205 = vst [vmem:[%s186_s7 + $0x8] sm:$0xff] (%p52_p3), %v204_v1  ;;  %v208_v3 = vld [vmem:[%s1060_s6 + $0x28] sm:$0xff] (%p52_p3) }
  0x11   : > { %207 = vst [vmem:[%s186_s7 + $0x10] sm:$0xff] %v206_v2  ;;  %v210_v4 = vld [vmem:[%s1060_s6 + $0x40] sm:$0xff]  ;;  %v212_v5 = vld [vmem:[%s1060_s6 + $0x48] sm:$0xff]  ;;  %209 = vst [vmem:[%s186_s7 + $0x18] sm:$0xff] %v208_v3 }
  0x12   : > { %211 = vst [vmem:[%s186_s7 + $0x20] sm:$0xff] %v210_v4  ;;  %213 = vst [vmem:[%s186_s7 + $0x28] sm:$0xff] %v212_v5  ;;  %v214_v6 = vld [vmem:[%s1060_s6 + $0x60] sm:$0xff]  ;;  %v216_v7 = vld [vmem:[%s1060_s6 + $0x68] sm:$0xff] }
  0x13   : > { %v218_v8 = vld [vmem:[%s1060_s6 + $0x80] sm:$0xff]  ;;  %215 = vst [vmem:[%s186_s7 + $0x30] sm:$0xff] %v214_v6  ;;  %217 = vst [vmem:[%s186_s7 + $0x38] sm:$0xff] %v216_v7  ;;  %v220_v9 = vld [vmem:[%s1060_s6 + $0x88] sm:$0xff] }
  0x14   : > { %219 = vst [vmem:[%s186_s7 + $0x40] sm:$0xff] %v218_v8  ;;  %v222_v10 = vld [vmem:[%s1060_s6 + $0xa0] sm:$0xff]  ;;  %v224_v11 = vld [vmem:[%s1060_s6 + $0xa8] sm:$0xff]  ;;  %221 = vst [vmem:[%s186_s7 + $0x48] sm:$0xff] %v220_v9 }
  0x15   : > { %223 = vst [vmem:[%s186_s7 + $0x50] sm:$0xff] %v222_v10  ;;  %225 = vst [vmem:[%s186_s7 + $0x58] sm:$0xff] %v224_v11  ;;  %v226_v12 = vld [vmem:[%s1060_s6 + $0xc0] sm:$0xff]  ;;  %v228_v13 = vld [vmem:[%s1060_s6 + $0xc8] sm:$0xff] }
  0x16   : > { %v230_v14 = vld [vmem:[%s1060_s6 + $0xe0] sm:$0xff]  ;;  %227 = vst [vmem:[%s186_s7 + $0x60] sm:$0xff] %v226_v12  ;;  %229 = vst [vmem:[%s186_s7 + $0x68] sm:$0xff] %v228_v13  ;;  %v232_v15 = vld [vmem:[%s1060_s6 + $0xe8] sm:$0xff] }
  0x17   : > { %231 = vst [vmem:[%s186_s7 + $0x70] sm:$0xff] %v230_v14  ;;  %233 = vst [vmem:[%s186_s7 + $0x78] sm:$0xff] %v232_v15 }
  0x18 PF: > { %p889_p5 = scmp.ge.s32.totalorder %s992_s20, 1  ;;  %p246_p6 = scmp.lt.s32.totalorder %s992_s20, 3 }
  0x1a   : > { %p247_p7 = pnand %p889_p5, %p246_p6 }
  0x1b   : > { %s253_s8 = sand.u32 (!%p247_p7), 1, %s984_s18   ;;  %s891_s7 = sshll.u32 (!%p247_p7), %s882_s21, 2 }
  0x1c   : > { %250 = sbr.rel (%p247_p7) target bundleno = 356 (0x164), region = 59  ;;  %s890_s15 = sshll.u32 (!%p247_p7), %s253_s8, 7 }
  0x1d   : > { %s1109_s6 = scalar_lea.vmem (!%p247_p7), [#allocation2], %s890_s15  ;;  %p286_p8 = scmp.lt.s32.totalorder (!%p247_p7), %s891_s7, 7 }
  0x21   : > { %v297_v16 = vld [vmem:[%s1261_s0] sm:$0xff]  ;;  %v298_v17 = vld [vmem:[%s1261_s0 + $0x8] sm:$0xff]  ;;  %v299_v18 = vld [vmem:[%s1261_s0 + $0x10] sm:$0xff]  ;;  %vm313_vm0 = vcmask 523264   ;;  %v994_v19 = vmov 0   ;;  %v395_v38 = vlaneseq  ;;  %vm433_vm2 = vcmask 1041409  }
  0x22   : > { %757 = vmatprep.mubr.bf16.mxu0 %v994_v19  ;;  %798 = vmatprep.mubr.bf16.mxu1 %v994_v19  ;;  %v300_v20 = vld [vmem:[%s1261_s0 + $0x18] sm:$0xff]  ;;  %v301_v21 = vld [vmem:[%s1261_s0 + $0x20] sm:$0xff]  ;;  %v302_v22 = vld [vmem:[%s1261_s0 + $0x28] sm:$0xff]  ;;  %v314_v23 = vsel %vm313_vm0, %v297_v16, 0.0  ;;  %v315_v24 = vsel %vm313_vm0, %v298_v17, 0.0  ;;  %v323_v28 = vsel %vm313_vm0, %v299_v18, 0.0 }
  0x23   : > { %v303_v25 = vld [vmem:[%s1261_s0 + $0x30] sm:$0xff]  ;;  %v304_v26 = vld [vmem:[%s1261_s0 + $0x38] sm:$0xff]  ;;  %v316_v27 = vadd.f32 %v315_v24, %v314_v23  ;;  %v324_v29 = vsel %vm313_vm0, %v300_v20, 0.0  ;;  %v332_v32 = vsel %vm313_vm0, %v301_v21, 0.0  ;;  %v333_v33 = vsel %vm313_vm0, %v302_v22, 0.0  ;;  %v305_v43 = vld [vmem:[%s1261_s0 + $0x40] sm:$0xff] }
  0x24   : > { %v944_v30 = vld [vmem:[%s1109_s6 + $0x64] ss:$16 sps:$4 sm:$0xff]   ;;  %v325_v31 = vadd.f32 %v324_v29, %v323_v28  ;;  %v946_v34 = vld [vmem:[%s1109_s6 + $0x6c] ss:$16 sps:$4 sm:$0xff]   ;;  %v334_v36 = vadd.f32 %v333_v33, %v332_v32  ;;  %v341_v37 = vsel %vm313_vm0, %v303_v25, 0.0  ;;  %v342_v46 = vsel %vm313_vm0, %v304_v26, 0.0 }
  0x25   : > { %v317_v35 = vrot.slane %v316_v27, 4  ;;  %733 = vmatprep.subr.bf16.mxu0 %v944_v30  ;;  %v948_v39 = vld [vmem:[%s1109_s6 + $0x60] ss:$16 sps:$4 sm:$0xff]   ;;  %v949_v40 = vld [vmem:[%s1109_s6 + $0x68] ss:$16 sps:$4 sm:$0xff]   ;;  %774 = vmatprep.subr.bf16.mxu1 %v946_v34  ;;  %v343_v50 = vadd.f32 %v342_v46, %v341_v37  ;;  %v1126_v54 = vshrl.u32 %v395_v38, 7 }
  0x26   : > { %v326_v41 = vrot.slane %v325_v31, 4  ;;  %v950_v42 = vld [vmem:[%s1109_s6 + $0x44] ss:$16 sps:$4 sm:$0xff]   ;;  %v335_v45 = vrot.slane %v334_v36, 4  ;;  %734 = vmatpush1.bf16.msra.mxu0 %v948_v39  ;;  %775 = vmatpush1.bf16.msra.mxu1 %v949_v40  ;;  %v952_v47 = vld [vmem:[%s1109_s6 + $0x4c] ss:$16 sps:$4 sm:$0xff]  }
  0x27   : > { %v318_v44 = vadd.f32 %v317_v35, %v316_v27  ;;  %v954_v48 = vld [vmem:[%s1109_s6 + $0x40] ss:$16 sps:$4 sm:$0xff]   ;;  %735 = vmatprep.subr.bf16.mxu0 %v950_v42  ;;  %v955_v51 = vld [vmem:[%s1109_s6 + $0x48] ss:$16 sps:$4 sm:$0xff]   ;;  %776 = vmatprep.subr.bf16.mxu1 %v952_v47  ;;  %v956_v55 = vld [vmem:[%s1109_s6 + $0x24] ss:$16 sps:$4 sm:$0xff]  }
  0x28   : > { %v327_v49 = vadd.f32 %v326_v41, %v325_v31  ;;  %v336_v53 = vadd.f32 %v335_v45, %v334_v36  ;;  %v344_v57 = vrot.slane %v343_v50, 4  ;;  %v958_v58 = vld [vmem:[%s1109_s6 + $0x2c] ss:$16 sps:$4 sm:$0xff]   ;;  %v960_v59 = vld [vmem:[%s1109_s6 + $0x20] ss:$16 sps:$4 sm:$0xff]   ;;  %v350_v2 = vsel %vm313_vm0, %v305_v43, 0.0 }
  0x29   : > { %v319_v52 = vrot.slane %v318_v44, 2  ;;  %v961_v60 = vld [vmem:[%s1109_s6 + $0x28] ss:$16 sps:$4 sm:$0xff]   ;;  %v962_v62 = vld [vmem:[%s1109_s6 + $0x4] ss:$16 sps:$4 sm:$0xff]   ;;  %vm397_vm1 = vcmp.lt.s32.totalorder %v1126_v54, 2 }
  0x2a   : > { %v328_v56 = vrot.slane %v327_v49, 2  ;;  %736 = vmatpush1.bf16.msra.mxu0 %v954_v48  ;;  %777 = vmatpush1.bf16.msra.mxu1 %v955_v51  ;;  %v337_v0 = vrot.slane %v336_v53, 2  ;;  %v345_v1 = vadd.f32 %v344_v57, %v343_v50  ;;  %v964_v3 = vld [vmem:[%s1109_s6 + $0xc] ss:$16 sps:$4 sm:$0xff]   ;;  %v966_v5 = vld [vmem:[%s1109_s6] ss:$16 sps:$4 sm:$0xff]  }
  0x2b   : > { %v320_v61 = vadd.f32 %v319_v52, %v318_v44  ;;  %737 = vmatprep.subr.bf16.mxu0 %v956_v55  ;;  %778 = vmatprep.subr.bf16.mxu1 %v958_v58  ;;  %v967_v6 = vld [vmem:[%s1109_s6 + $0x8] ss:$16 sps:$4 sm:$0xff]   ;;  %v307_v10 = vld [vmem:[%s1261_s0 + $0x50] sm:$0xff]  ;;  %v309_v12 = vld [vmem:[%s1261_s0 + $0x60] sm:$0xff]  ;;  %v995_v34 = vmov 0.0   ;;  %vm436_vm3 = vcmask 1042434  }
  0x2c   : > { %v329_v63 = vadd.f32 %v328_v56, %v327_v49  ;;  %v306_v7 = vld [vmem:[%s1261_s0 + $0x48] sm:$0xff]  ;;  %v338_v9 = vadd.f32 %v337_v0, %v336_v53  ;;  %v308_v11 = vld [vmem:[%s1261_s0 + $0x58] sm:$0xff]  ;;  %v346_v14 = vrot.slane %v345_v1, 2  ;;  %v311_v17 = vld [vmem:[%s1261_s0 + $0x70] sm:$0xff]  ;;  %v359_v22 = vsel %vm313_vm0, %v307_v10, 0.0  ;;  %s1271_s7 = smov (!%p286_p8, %s891_s7), 7 }
  0x2d   : > { %v321_v4 = vrot.slane %v320_v61, 1  ;;  %v351_v15 = vsel %vm313_vm0, %v306_v7, 0.0  ;;  %v310_v16 = vld [vmem:[%s1261_s0 + $0x68] sm:$0xff]  ;;  %v312_v18 = vld [vmem:[%s1261_s0 + $0x78] sm:$0xff]  ;;  %v360_v24 = vsel %vm313_vm0, %v308_v11, 0.0  ;;  %v368_v25 = vsel %vm313_vm0, %v309_v12, 0.0  ;;  %s288_s10 = scalar_lea.vmem %s1263_s2, %s1271_s7 }
  0x2e   : > { %v330_v8 = vrot.slane %v329_v63, 1  ;;  %738 = vmatpush1.bf16.msra.mxu0 %v960_v59  ;;  %779 = vmatpush1.bf16.msra.mxu1 %v961_v60  ;;  %v339_v20 = vrot.slane %v338_v9, 1  ;;  %v352_v21 = vadd.f32 %v351_v15, %v350_v2  ;;  %v347_v23 = vadd.f32 %v346_v14, %v345_v1  ;;  %s893_s11 = sshll.u32 %s1271_s7, 3 }
  0x2f   : > { %v322_v13 = vadd.f32 %v321_v4, %v320_v61  ;;  %739 = vmatprep.subr.bf16.mxu0 %v962_v62  ;;  %780 = vmatprep.subr.bf16.mxu1 %v964_v3  ;;  %v369_v26 = vsel %vm313_vm0, %v310_v16, 0.0  ;;  %v361_v29 = vadd.f32 %v360_v24, %v359_v22  ;;  %v377_v32 = vsel %vm313_vm0, %v311_v17, 0.0  ;;  %s294_s21 = scalar_lea.vmem %s1266_s5, %s893_s11 }
  0x30   : > { %v331_v19 = vadd.f32 %v330_v8, %v329_v63  ;;  %v340_v27 = vadd.f32 %v339_v20, %v338_v9  ;;  %v353_v28 = vrot.slane %v352_v21, 4  ;;  %v370_v30 = vadd.f32 %v369_v26, %v368_v25 }
  0x31   : > { %v348_v31 = vrot.slane %v347_v23, 1  ;;  %v378_v33 = vsel %vm313_vm0, %v312_v18, 0.0  ;;  %v1168_v35 = vsel %vm397_vm1, 1.0, %v995_v34  ;;  %v362_v37 = vrot.slane %v361_v29, 4 }
  0x32   : > { %740 = vmatpush1.bf16.msra.mxu0 %v966_v5  ;;  %781 = vmatpush1.bf16.msra.mxu1 %v967_v6  ;;  %v354_v36 = vadd.f32 %v353_v28, %v352_v21  ;;  %v371_v38 = vrot.slane %v370_v30, 4  ;;  %v379_v39 = vadd.f32 %v378_v33, %v377_v32  ;;  %v387_v41 = vmul.f32 0.0625, %v322_v13 }
  0x33   : > { %v349_v40 = vadd.f32 %v348_v31, %v347_v23  ;;  %v388_v42 = vmul.f32 0.0625, %v331_v19  ;;  %v389_v43 = vmul.f32 0.0625, %v340_v27  ;;  %v363_v45 = vadd.f32 %v362_v37, %v361_v29 }
  0x34   : > { %v355_v44 = vrot.slane %v354_v36, 2  ;;  %v372_v46 = vadd.f32 %v371_v38, %v370_v30  ;;  %v380_v47 = vrot.slane %v379_v39, 4  ;;  %v401_v49 = vrot.slane %v1168_v35, 1 }
  0x35   : > { %v390_v48 = vmul.f32 0.0625, %v349_v40  ;;  %v402_v50 = vrot.slane %v1168_v35, 2  ;;  %v403_v51 = vrot.slane %v1168_v35, 3  ;;  %v364_v53 = vrot.slane %v363_v45, 2 }
  0x36   : > { %v356_v52 = vadd.f32 %v355_v44, %v354_v36  ;;  %v373_v55 = vrot.slane %v372_v46, 2  ;;  %v381_v56 = vadd.f32 %v380_v47, %v379_v39  ;;  %v404_v57 = vrot.slane %v1168_v35, 4 }
  0x37   : > { %v405_v58 = vrot.slane %v1168_v35, 5  ;;  %v406_v59 = vrot.slane %v1168_v35, 6  ;;  %v416_v60 = vmul.f32 %v1168_v35, %v387_v41  ;;  %v365_v62 = vadd.f32 %v364_v53, %v363_v45 }
  0x38   : > { %v357_v61 = vrot.slane %v356_v52, 1  ;;  %v374_v63 = vadd.f32 %v373_v55, %v372_v46  ;;  %v382_v0 = vrot.slane %v381_v56, 2  ;;  %v417_v1 = vmul.f32 %v401_v49, %v388_v42 }
  0x39   : > { %v418_v2 = vmul.f32 %v402_v50, %v389_v43  ;;  %v419_v3 = vmul.f32 %v403_v51, %v390_v48  ;;  %v366_v5 = vrot.slane %v365_v62, 1  ;;  %v407_v15 = vrot.slane %v1168_v35, 7 }
  0x3a   : > { %v358_v4 = vadd.f32 %v357_v61, %v356_v52  ;;  %v375_v6 = vrot.slane %v374_v63, 1  ;;  %v383_v7 = vadd.f32 %v382_v0, %v381_v56  ;;  %v432_v8 = vrot.slane %v417_v1, 7 }
  0x3b   : > { %v435_v9 = vrot.slane %v418_v2, 6  ;;  %v438_v10 = vrot.slane %v419_v3, 5  ;;  %v367_v11 = vadd.f32 %v366_v5, %v365_v62  ;;  %vm439_vm4 = vcmask 1043459  }
  0x3c   : > { %v376_v12 = vadd.f32 %v375_v6, %v374_v63  ;;  %v384_v13 = vrot.slane %v383_v7, 1  ;;  %v391_v14 = vmul.f32 0.0625, %v358_v4  ;;  %v434_v16 = vsel %vm433_vm2, %v432_v8, %v416_v60 }
  0x3d   : > { %v392_v18 = vmul.f32 0.0625, %v367_v11  ;;  %v437_v21 = vsel %vm436_vm3, %v435_v9, %v434_v16  ;;  %vm442_vm5 = vcmask 1044484   ;;  %vm445_vm6 = vcmask 1045509  }
  0x3e   : > { %v385_v17 = vadd.f32 %v384_v13, %v383_v7  ;;  %v393_v19 = vmul.f32 0.0625, %v376_v12  ;;  %v420_v20 = vmul.f32 %v404_v57, %v391_v14  ;;  %v440_v25 = vsel %vm439_vm4, %v438_v10, %v437_v21 }
  0x3f   : > { %v421_v23 = vmul.f32 %v405_v58, %v392_v18  ;;  %vm448_vm7 = vcmask 1046534   ;;  %vm451_vm8 = vcmask 1047559   ;;  %v1199_v43 = vsub.s32 0, %v1126_v54 }
  0x40   : > { %v394_v22 = vmul.f32 0.0625, %v385_v17  ;;  %v422_v24 = vmul.f32 %v406_v59, %v393_v19  ;;  %v441_v26 = vrot.slane %v420_v20, 4 }
  0x41   : > { %v444_v28 = vrot.slane %v421_v23, 3 }
  0x42   : > { %v423_v27 = vmul.f32 %v407_v15, %v394_v22  ;;  %v447_v29 = vrot.slane %v422_v24, 2  ;;  %v443_v30 = vsel %vm442_vm5, %v441_v26, %v440_v25 }
  0x43   : > { %v446_v31 = vsel %vm445_vm6, %v444_v28, %v443_v30 }
  0x44   : > { %v450_v32 = vrot.slane %v423_v27, 1  ;;  %v449_v33 = vsel %vm448_vm7, %v447_v29, %v446_v31  ;;  %v895_v31 = vld [vmem:[%s1264_s3] ss:$0 sm:$0xff] }
  0x46   : > { %v452_v34 = vsel %vm451_vm8, %v450_v32, %v449_v33 }
  0x47   : > { %v454_v36 = vsel %vm313_vm0, %v452_v34, 0.0 }
  0x48   : > { %v455_v37 = vrot.slane %v454_v36, 4 }
  0x4a   : > { %v456_v38 = vadd.f32 %v455_v37, %v454_v36 }
  0x4c   : > { %v457_v39 = vrot.slane %v456_v38, 2 }
  0x4e   : > { %v458_v40 = vadd.f32 %v457_v39, %v456_v38 }
  0x50   : > { %v459_v41 = vrot.slane %v458_v40, 1 }
  0x52   : > { %v460_v42 = vadd.f32 %v459_v41, %v458_v40  ;;  %v896_v41 = vld [vmem:[%s1265_s4] ss:$0 sm:$0xff] }
  0x54   : > { %v461_v44 = vmul.f32 0.5, %v460_v42 }
  0x56   : > { %v465_v45 = vrot.slane %v461_v44, %v1199_v43 }
  0x58   : > { %v466_v46 = vsub.f32 %v416_v60, %v465_v45  ;;  %v467_v47 = vsub.f32 %v417_v1, %v465_v45  ;;  %v468_v48 = vsub.f32 %v418_v2, %v465_v45  ;;  %v469_v52 = vsub.f32 %v419_v3, %v465_v45 }
  0x59   : > { %v470_v53 = vsub.f32 %v420_v20, %v465_v45  ;;  %v471_v55 = vsub.f32 %v421_v23, %v465_v45  ;;  %v472_v56 = vsub.f32 %v422_v24, %v465_v45  ;;  %v473_v61 = vsub.f32 %v423_v27, %v465_v45 }
  0x5a   : > { %v474_v62 = vmul.f32 %v1168_v35, %v466_v46  ;;  %v475_v63 = vmul.f32 %v467_v47, %v401_v49  ;;  %v476_v0 = vmul.f32 %v468_v48, %v402_v50  ;;  %v477_v4 = vmul.f32 %v469_v52, %v403_v51 }
  0x5b   : > { %v478_v60 = vmul.f32 %v470_v53, %v404_v57  ;;  %v479_v1 = vmul.f32 %v471_v55, %v405_v58  ;;  %v480_v2 = vmul.f32 %v472_v56, %v406_v59  ;;  %v481_v3 = vmul.f32 %v473_v61, %v407_v15 }
  0x5c   : > { %v482_v5 = vmul.f32 %v474_v62, %v474_v62  ;;  %v483_v6 = vmul.f32 %v475_v63, %v475_v63  ;;  %v484_v7 = vmul.f32 %v476_v0, %v476_v0  ;;  %v485_v49 = vmul.f32 %v477_v4, %v477_v4 }
  0x5d   : > { %v486_v8 = vmul.f32 %v478_v60, %v478_v60  ;;  %v487_v9 = vmul.f32 %v479_v1, %v479_v1  ;;  %v488_v50 = vmul.f32 %v480_v2, %v480_v2  ;;  %v489_v10 = vmul.f32 %v481_v3, %v481_v3 }
  0x5e   : > { %v498_v11 = vrot.slane %v483_v6, 7  ;;  %v500_v51 = vrot.slane %v484_v7, 6  ;;  %v502_v12 = vrot.slane %v485_v49, 5 }
  0x5f   : > { %v504_v13 = vrot.slane %v486_v8, 4  ;;  %v506_v14 = vrot.slane %v487_v9, 3  ;;  %v508_v35 = vrot.slane %v488_v50, 2  ;;  %v510_v15 = vrot.slane %v489_v10, 1 }
  0x60   : > { %v499_v57 = vsel %vm433_vm2, %v498_v11, %v482_v5 }
  0x61   : > { %v501_v58 = vsel %vm436_vm3, %v500_v51, %v499_v57 }
  0x62   : > { %v503_v59 = vsel %vm439_vm4, %v502_v12, %v501_v58 }
  0x63   : > { %v505_v16 = vsel %vm442_vm5, %v504_v13, %v503_v59 }
  0x64   : > { %v507_v17 = vsel %vm445_vm6, %v506_v14, %v505_v16 }
  0x65   : > { %v509_v18 = vsel %vm448_vm7, %v508_v35, %v507_v17 }
  0x66   : > { %v511_v19 = vsel %vm451_vm8, %v510_v15, %v509_v18 }
  0x67   : > { %v513_v20 = vsel %vm313_vm0, %v511_v19, 0.0 }
  0x68   : > { %v514_v21 = vrot.slane %v513_v20, 4 }
  0x6a   : > { %v515_v22 = vadd.f32 %v514_v21, %v513_v20 }
  0x6c   : > { %v516_v23 = vrot.slane %v515_v22, 2 }
  0x6e   : > { %v517_v24 = vadd.f32 %v516_v23, %v515_v22 }
  0x70   : > { %v518_v25 = vrot.slane %v517_v24, 1 }
  0x72   : > { %v519_v26 = vadd.f32 %v518_v25, %v517_v24 }
  0x74   : > { %v520_v27 = vmul.f32 0.5, %v519_v26  ;;  %v589_v26 = vld [vmem:[%s288_s10] sm:$0xf] }
  0x76   : > { %v521_v28 = vadd.f32 1e-05, %v520_v27  ;;  %v597_v27 = vsub.s32 1, %v1126_v54 }
  0x78   : > { %968 = vrsqrt.f32 %v521_v28  ;;  %v601_v28 = vsub.s32 2, %v1126_v54 }
  0x85   : > { %v969_v29 = vpop.eup %968 }
  0x86   : > { %v526_v30 = vrot.slane %v969_v29, %v1199_v43  ;;  %v594_v29 = vrot.slane %v589_v26, %v1199_v43 }
  0x88   : > { %v527_v32 = vmul.f32 %v526_v30, %v466_v46  ;;  %v528_v33 = vmul.f32 %v526_v30, %v467_v47  ;;  %v529_v34 = vmul.f32 %v526_v30, %v468_v48  ;;  %v530_v36 = vmul.f32 %v526_v30, %v469_v52 }
  0x89   : > { %v531_v37 = vmul.f32 %v526_v30, %v470_v53  ;;  %v532_v38 = vmul.f32 %v526_v30, %v471_v55  ;;  %v533_v39 = vmul.f32 %v526_v30, %v472_v56  ;;  %v534_v40 = vmul.f32 %v526_v30, %v473_v61 }
  0x8a   : > { %v542_v42 = vmul.f32 %v895_v31, %v527_v32  ;;  %v543_v44 = vmul.f32 %v895_v31, %v528_v33  ;;  %v544_v45 = vmul.f32 %v895_v31, %v529_v34  ;;  %v545_v62 = vmul.f32 %v895_v31, %v530_v36 }
  0x8b   : > { %v546_v63 = vmul.f32 %v895_v31, %v531_v37  ;;  %v547_v0 = vmul.f32 %v895_v31, %v532_v38  ;;  %v548_v4 = vmul.f32 %v895_v31, %v533_v39  ;;  %v549_v60 = vmul.f32 %v895_v31, %v534_v40 }
  0x8c   : > { %v557_v46 = vadd.f32 %v896_v41, %v542_v42  ;;  %v558_v47 = vadd.f32 %v896_v41, %v543_v44  ;;  %v559_v48 = vadd.f32 %v896_v41, %v544_v45  ;;  %v560_v52 = vadd.f32 %v896_v41, %v545_v62 }
  0x8d   : > { %v561_v53 = vadd.f32 %v896_v41, %v546_v63  ;;  %v562_v55 = vadd.f32 %v896_v41, %v547_v0  ;;  %v563_v56 = vadd.f32 %v896_v41, %v548_v4  ;;  %v564_v61 = vadd.f32 %v896_v41, %v549_v60 }
  0x8e   : > { %v565_v1 = vpack.c.bf16 %v557_v46, %v557_v46  ;;  %v566_v2 = vpack.c.bf16 %v558_v47, %v558_v47  ;;  %v567_v3 = vpack.c.bf16 %v559_v48, %v559_v48  ;;  %v568_v5 = vpack.c.bf16 %v560_v52, %v560_v52 }
  0x8f   : > { %v569_v6 = vpack.c.bf16 %v561_v53, %v561_v53  ;;  %v570_v7 = vpack.c.bf16 %v562_v55, %v562_v55  ;;  %v571_v49 = vpack.c.bf16 %v563_v56, %v563_v56  ;;  %v572_v8 = vpack.c.bf16 %v564_v61, %v564_v61 }
  0x90   : > { %v619_v9 = vunpack.c.l.b16 %v565_v1  ;;  %v620_v50 = vunpack.c.l.b16 %v566_v2  ;;  %v621_v10 = vunpack.c.l.b16 %v567_v3  ;;  %v622_v11 = vunpack.c.l.b16 %v568_v5 }
  0x91   : > { %v623_v51 = vunpack.c.l.b16 %v569_v6  ;;  %v624_v12 = vunpack.c.l.b16 %v570_v7  ;;  %v625_v13 = vunpack.c.l.b16 %v571_v49  ;;  %v626_v57 = vunpack.c.l.b16 %v572_v8 }
  0x92   : > { %v627_v14 = vrot.slane %v620_v50, 7  ;;  %v629_v58 = vrot.slane %v621_v10, 6  ;;  %v631_v35 = vrot.slane %v622_v11, 5  ;;  %v605_v30 = vsub.s32 3, %v1126_v54 }
  0x93   : > { %v633_v59 = vrot.slane %v623_v51, 4  ;;  %v635_v16 = vrot.slane %v624_v12, 3  ;;  %v637_v18 = vrot.slane %v625_v13, 2  ;;  %v639_v20 = vrot.slane %v626_v57, 1 }
  0x94   : > { %v628_v15 = vsel %vm433_vm2, %v627_v14, %v619_v9  ;;  %v598_v31 = vrot.slane %v589_v26, %v597_v27  ;;  %v602_v33 = vrot.slane %v589_v26, %v601_v28  ;;  %v606_v37 = vrot.slane %v589_v26, %v605_v30 }
  0x95   : > { %v630_v17 = vsel %vm436_vm3, %v629_v58, %v628_v15 }
  0x96   : > { %v632_v19 = vsel %vm439_vm4, %v631_v35, %v630_v17 }
  0x97   : > { %v634_v21 = vsel %vm442_vm5, %v633_v59, %v632_v19 }
  0x98   : > { %v636_v22 = vsel %vm445_vm6, %v635_v16, %v634_v21 }
  0x99   : > { %v638_v23 = vsel %vm448_vm7, %v637_v18, %v636_v22 }
  0x9a   : > { %v640_v24 = vsel %vm451_vm8, %v639_v20, %v638_v23 }
  0x9b   : > { %v641_v25 = vpack.c.b16 %v640_v24, %v640_v24 }
  0x9d   : > { %913 = vmatmul.mubr.msk.bf16.vlgmr.msra.gmra.mxu0 %vm313_vm0, %v641_v25  ;;  %914 = vmatmul.mubr.msk.bf16.vlgmr.msra.gmra.mxu1 %vm313_vm0, %v641_v25 }
 0x15d   : > { %v759_v32 = vpop.f32.mrf.mxu0  ;;  %v800_v34 = vpop.f32.mrf.mxu1 }
 0x15e   : > { %v760_v36 = vadd.f32 %v759_v32, %v594_v29  ;;  %v801_v41 = vadd.f32 %v800_v34, %v602_v33 }
 0x15f   : > { %v761_v38 = vpop.f32.mrf.mxu0  ;;  %v802_v39 = vpop.f32.mrf.mxu1 }
 0x160   : > { %807 = vst [vmem:[%s294_s21] sm:$0xff] %v760_v36  ;;  %v762_v40 = vadd.f32 %v761_v38, %v598_v31  ;;  %v803_v43 = vadd.f32 %v802_v39, %v606_v37  ;;  %809 = vst [vmem:[%s294_s21 + $0x10] sm:$0xff] %v801_v41 }
 0x161   : > { %v763_v42 = vpop.f32.mrf.mxu0  ;;  %v804_v44 = vpop.f32.mrf.mxu1 }
 0x162   : > { %808 = vst [vmem:[%s294_s21 + $0x8] sm:$0xff] %v762_v40  ;;  %810 = vst [vmem:[%s294_s21 + $0x18] sm:$0xff] %v803_v43 }
 0x163   : > { %v764_v54 = vpop.f32.mrf.mxu0  ;;  %v805_v45 = vpop.f32.mrf.mxu1 }
 0x164 PF: > { %p12_p9 = scmp.ge.s32.totalorder %s1043_s22, 4   ;;  %s1267_s18 = smov %s988_s19 }
 0x165   : > { %s1268_s19 = smov %s1052_s25  ;;  %s1269_s20 = smov %s1043_s22 }
 0x166   :  { %14 = sbr.rel (!%p12_p9) target bundleno = 2 (0x2), region = 101 }

</bundles_post_ra>
